<compile_context>
chip_gen: v6e
topology: v6e:2x2x1
jax: 0.10.0
libtpu: 0.0.40
codegen_flags: <defaults>
</compile_context>

<pallas_src>
import math
import jax
import jax.numpy as jnp
from jax import lax
from jax.experimental import pallas as pl
from jax.experimental.pallas import tpu as pltpu


def _round_up(v, m):
    return ((v + m - 1) // m) * m


def _masked_linear_kernel(x_ref, w_ref, m_ref, b_ref, o_ref):
    k = pl.program_id(2)

    # Output block index ignores k -> the (tm, tn) tile is VMEM-resident across the k sweep.
    # Initialize it with the broadcast bias (removes the end-of-sweep add).
    @pl.when(k == 0)
    def _():
        o_ref[...] = jnp.broadcast_to(b_ref[...], o_ref.shape)

    # VPU mask multiply (filler under an MXU/DMA-bound kernel); int8 mask upcast to f32.
    masked_w = w_ref[...] * m_ref[...].astype(jnp.float32)          # (tn, tk)

    # Contract the shared last (lane) dim of x (tm, tk) and masked_w (tn, tk) -> (tm, tn).
    o_ref[...] += lax.dot_general(
        x_ref[...], masked_w,
        dimension_numbers=(((1,), (1,)), ((), ())),
        preferred_element_type=jnp.float32,
    )


def masked_linear(x, weight, mask, bias=None, *, tm=None, tn=None, tk=None,
                  binary_mask=True):
    """y = x @ (weight * mask)^T + bias  (matches F.linear(input, weight*mask, bias)).

    x: (..., in_features); weight/mask: (out, in); bias: (out,) or None.
    Leading dims of x are flattened (F.linear's (N, *, in) contract).
    tm/tn/tk are tile-size hints; by default they are derived from VMEM capacity.
    binary_mask=True streams the mask as int8 (exact only for {0,1} masks).
    """
    orig_shape = x.shape
    in_f = orig_shape[-1]
    x2d = x.reshape(-1, in_f).astype(jnp.float32)
    n_rows = x2d.shape[0]
    out_f = weight.shape[0]
    if bias is None:
        bias = jnp.zeros((out_f,), dtype=jnp.float32)

    # --- (8, 128)-aligned logical dims ---------------------------------------------
    mp0 = _round_up(max(n_rows, 1), 8)
    kp0 = _round_up(in_f, 128)
    op0 = _round_up(out_f, 128)

    # --- VMEM-aware tile selection ---------------------------------------------------
    try:
        vmem_cap = int(pltpu.get_tpu_info().vmem_capacity_bytes)
    except Exception:
        vmem_cap = 64 * 1024 * 1024          # conservative (v7x-sized) fallback
    vmem_limit = max(32 * 1024 * 1024,
                     min(int(vmem_cap * 0.75), vmem_cap - 4 * 1024 * 1024))
    tile_budget = int(vmem_cap * 0.60)       # double-buffered working-set budget

    m_bytes = 1 if binary_mask else 4

    def _split(dim, target, align):
        # Pick a tile ~target that splits `dim` with minimal padding; returns (tile, padded_dim).
        target = max(align, _round_up(min(target, dim), align))
        n = pl.cdiv(dim, target)
        t = _round_up(pl.cdiv(dim, n), align)
        return t, n * t

    def _shrink(t_cur, dim, align):
        return _split(dim, max(align, t_cur // 2), align)

    def _wset(tm_, tn_, tk_):
        # double-buffered x + W + M + resident/double-buffered out + bias
        return (2 * tm_ * tk_ * 4 + 2 * tn_ * tk_ * 4 + 2 * tn_ * tk_ * m_bytes
                + 2 * tm_ * tn_ * 4 + 2 * tn_ * 4)

    # Targets: big tm (stream weights once), tn ~512, tk ~2048 (amortize per-step overhead).
    tm_t = tm if tm is not None else min(mp0, 2048)
    tk_t = tk if tk is not None else min(kp0, 2048)
    if tn is not None:
        tn_t = tn
    else:
        tn_t = min(op0, 512)
        # v7x: if the i axis is a single step, make sure the parallel j axis has >= 2 tiles.
        if mp0 <= tm_t and op0 >= 256:
            tn_t = min(tn_t, _round_up(pl.cdiv(op0, 2), 128))

    tm_e, Mp = _split(mp0, tm_t, 8)
    tn_e, Op = _split(op0, tn_t, 128)
    tk_e, Kp = _split(kp0, tk_t, 128)

    # Shrink under the VMEM budget (keeps the kernel valid on v7x's 64 MiB VMEM).
    while _wset(tm_e, tn_e, tk_e) > tile_budget:
        if tm_e > 1024:
            tm_e, Mp = _shrink(tm_e, mp0, 8)
        elif tk_e > 1024:
            tk_e, Kp = _shrink(tk_e, kp0, 128)
        elif tm_e > 256:
            tm_e, Mp = _shrink(tm_e, mp0, 8)
        elif tn_e > 256:
            tn_e, Op = _shrink(tn_e, op0, 128)
        elif tk_e > 256:
            tk_e, Kp = _shrink(tk_e, kp0, 128)
        elif tn_e > 128:
            tn_e, Op = _shrink(tn_e, op0, 128)
        elif tm_e > 8:
            tm_e, Mp = _shrink(tm_e, mp0, 8)
        elif tk_e > 128:
            tk_e, Kp = _shrink(tk_e, kp0, 128)
        else:
            break

    grid = (Mp // tm_e, Op // tn_e, Kp // tk_e)
    ni, nj, nk = grid

    # --- pad inputs ------------------------------------------------------------------
    xp = jnp.pad(x2d, ((0, Mp - n_rows), (0, Kp - in_f)))
    wp = jnp.pad(weight.astype(jnp.float32), ((0, Op - out_f), (0, Kp - in_f)))
    m_cast = mask.astype(jnp.int8) if binary_mask else mask.astype(jnp.float32)
    mkp = jnp.pad(m_cast, ((0, Op - out_f), (0, Kp - in_f)))
    bp = jnp.pad(bias.astype(jnp.float32), (0, Op - out_f)).reshape(1, Op)

    # Honest byte counts for the chosen (i, j, k) loop nest:
    #   x is re-streamed once per j tile; W and M once per i tile.
    cost = pl.CostEstimate(
        flops=2 * Mp * Op * Kp + ni * Op * Kp + Mp * Op,
        transcendentals=0,
        bytes_accessed=(nj * Mp * Kp * 4
                        + ni * Op * Kp * 4
                        + ni * Op * Kp * m_bytes
                        + ni * nj * tn_e * 4
                        + Mp * Op * 4),
    )

    out_padded = pl.pallas_call(
        _masked_linear_kernel,
        out_shape=jax.ShapeDtypeStruct((Mp, Op), jnp.float32),
        grid_spec=pltpu.PrefetchScalarGridSpec(
            num_scalar_prefetch=0,
            grid=grid,
            in_specs=[
                pl.BlockSpec((tm_e, tk_e), lambda i, j, k: (i, k)),   # x
                pl.BlockSpec((tn_e, tk_e), lambda i, j, k: (j, k)),   # W (f32)
                pl.BlockSpec((tn_e, tk_e), lambda i, j, k: (j, k)),   # M (int8)
                pl.BlockSpec((1, tn_e), lambda i, j, k: (0, j)),      # bias
            ],
            out_specs=pl.BlockSpec((tm_e, tn_e), lambda i, j, k: (i, j)),
        ),
        compiler_params=pltpu.CompilerParams(
            dimension_semantics=("parallel", "parallel", "arbitrary"),
            vmem_limit_bytes=vmem_limit,
        ),
        cost_estimate=cost,
    )(xp, wp, mkp, bp)

    out = out_padded[:n_rows, :out_f].astype(x.dtype)
    return out.reshape(orig_shape[:-1] + (out_f,))


if __name__ == "__main__":
    # TODO(synk): prune() mutates parameters on the host; it is not part of the forward pass.
    key = jax.random.PRNGKey(0)
    kx, kw, kb, kx2, kw2, kb2 = jax.random.split(key, 6)

    # --- small demo, matching the module's reset_parameters() init; 3-D input exercises
    #     the (N, *, in) flattening contract --------------------------------------------
    in_features, out_features, batch, extra = 32, 16, 2, 4
    stdv = 1.0 / math.sqrt(in_features)
    x = jax.random.normal(kx, (batch, extra, in_features), dtype=jnp.float32)
    weight = jax.random.uniform(kw, (out_features, in_features),
                                minval=-stdv, maxval=stdv, dtype=jnp.float32)
    bias = jax.random.uniform(kb, (out_features,),
                              minval=-stdv, maxval=stdv, dtype=jnp.float32)
    mask = jnp.where(jnp.abs(weight) < 0.5 * stdv, 0.0, 1.0).astype(jnp.float32)

    y = jax.block_until_ready(masked_linear(x, weight, mask, bias))
    y_ref = x @ (weight * mask).T + bias
    assert y.shape == (batch, extra, out_features)
    assert jnp.allclose(y, y_ref, atol=1e-5, rtol=1e-5), "mismatch vs reference (small)"

    # --- second check: force a multi-tile (i, j, k) grid to exercise the resident-output
    #     accumulator and bias init across k --------------------------------------------
    in2, out2, batch2 = 256, 256, 16
    stdv2 = 1.0 / math.sqrt(in2)
    x2 = jax.random.normal(kx2, (batch2, in2), dtype=jnp.float32)
    w2 = jax.random.uniform(kw2, (out2, in2), minval=-stdv2, maxval=stdv2,
                            dtype=jnp.float32)
    b2 = jax.random.uniform(kb2, (out2,), minval=-stdv2, maxval=stdv2,
                            dtype=jnp.float32)
    m2 = jnp.where(jnp.abs(w2) < 0.5 * stdv2, 0.0, 1.0).astype(jnp.float32)

    y2 = jax.block_until_ready(masked_linear(x2, w2, m2, b2, tm=8, tn=128, tk=128))
    y2_ref = x2 @ (w2 * m2).T + b2
    assert y2.shape == (batch2, out2)
    assert jnp.allclose(y2, y2_ref, atol=1e-4, rtol=1e-4), "mismatch vs reference (tiled)"

    # --- third check: auto tile selection on the same shapes (single-k grid path) ------
    y3 = jax.block_until_ready(masked_linear(x2, w2, m2, b2))
    assert jnp.allclose(y3, y2_ref, atol=1e-4, rtol=1e-4), "mismatch vs reference (auto)"

    print("KERNEL_OK")
</pallas_src>

<mosaic_0001>
module attributes {stable_mosaic.version = 11 : i64} {
  func.func @_masked_linear_kernel(%arg0: i32, %arg1: i32, %arg2: i32, %arg3: memref<8x128xf32, #tpu.memory_space<vmem>>, %arg4: memref<128x128xf32, #tpu.memory_space<vmem>>, %arg5: memref<128x128xi8, #tpu.memory_space<vmem>>, %arg6: memref<1x128xf32, #tpu.memory_space<vmem>>, %arg7: memref<8x128xf32, #tpu.memory_space<vmem>>) attributes {dimension_semantics = [#tpu.dimension_semantics<parallel>, #tpu.dimension_semantics<parallel>, #tpu.dimension_semantics<arbitrary>], iteration_bounds = array<i64: 1, 1, 1>, scalar_prefetch = 0 : i64, scratch_operands = 0 : i64, tpu.core_type = #tpu.core_type<tc>, window_params = [{transform_indices = @transform_0, window_bounds = array<i64: 8, 128>}, {transform_indices = @transform_1, window_bounds = array<i64: 128, 128>}, {transform_indices = @transform_2, window_bounds = array<i64: 128, 128>}, {transform_indices = @transform_3, window_bounds = array<i64: 1, 128>}, {transform_indices = @transform_4, window_bounds = array<i64: 8, 128>}]} {
    %c0_i32 = arith.constant 0 : i32
    %0 = arith.cmpi eq, %arg2, %c0_i32 : i32
    %1 = arith.extui %0 : i1 to i32
    %c0_i32_0 = arith.constant 0 : i32
    %2 = arith.cmpi ne, %1, %c0_i32_0 : i32
    scf.if %2 {
      %c0_10 = arith.constant 0 : index
      %c0_11 = arith.constant 0 : index
      %12 = vector.load %arg6[%c0_10, %c0_11] : memref<1x128xf32, #tpu.memory_space<vmem>>, vector<1x128xf32>
      %13 = vector.shape_cast %12 : vector<1x128xf32> to vector<1x128xf32>
      %14 = vector.broadcast %13 : vector<1x128xf32> to vector<8x128xf32>
      %c0_12 = arith.constant 0 : index
      %c0_13 = arith.constant 0 : index
      %15 = vector.load %arg7[%c0_12, %c0_13] : memref<8x128xf32, #tpu.memory_space<vmem>>, vector<8x128xf32>
      tpu.vector_store %arg7[%c0_12, %c0_13], %14 {strides = array<i32>} : memref<8x128xf32, #tpu.memory_space<vmem>>, vector<8x128xf32>,
    } else {
    }
    %c0 = arith.constant 0 : index
    %c0_1 = arith.constant 0 : index
    %3 = vector.load %arg4[%c0, %c0_1] : memref<128x128xf32, #tpu.memory_space<vmem>>, vector<128x128xf32>
    %c0_2 = arith.constant 0 : index
    %c0_3 = arith.constant 0 : index
    %4 = vector.load %arg5[%c0_2, %c0_3] : memref<128x128xi8, #tpu.memory_space<vmem>>, vector<128x128xi8>
    %5 = arith.sitofp %4 : vector<128x128xi8> to vector<128x128xf32>
    %6 = arith.mulf %3, %5 : vector<128x128xf32>
    %c0_4 = arith.constant 0 : index
    %c0_5 = arith.constant 0 : index
    %7 = vector.load %arg7[%c0_4, %c0_5] : memref<8x128xf32, #tpu.memory_space<vmem>>, vector<8x128xf32>
    %c0_6 = arith.constant 0 : index
    %c0_7 = arith.constant 0 : index
    %8 = vector.load %arg3[%c0_6, %c0_7] : memref<8x128xf32, #tpu.memory_space<vmem>>, vector<8x128xf32>
    %cst = arith.constant dense<0.000000e+00> : vector<8x128xf32>
    %9 = tpu.matmul %8, %6, %cst {dimension_numbers = #tpu.dot_dimension_numbers<[1], [1], [0], [0], [0, 0, 1, 0], [], []>} : vector<8x128xf32>, vector<128x128xf32>, vector<8x128xf32> -> vector<8x128xf32>
    %10 = arith.addf %7, %9 : vector<8x128xf32>
    %c0_8 = arith.constant 0 : index
    %c0_9 = arith.constant 0 : index
    %11 = vector.load %arg7[%c0_8, %c0_9] : memref<8x128xf32, #tpu.memory_space<vmem>>, vector<8x128xf32>
    tpu.vector_store %arg7[%c0_8, %c0_9], %10 {strides = array<i32>} : memref<8x128xf32, #tpu.memory_space<vmem>>, vector<8x128xf32>,
    return
  }
  func.func @transform_0(%arg0: i32, %arg1: i32, %arg2: i32) -> (i32, i32) {
    %c0_i32 = arith.constant 0 : i32
    return %arg0, %arg2 : i32, i32
  }
  func.func @transform_1(%arg0: i32, %arg1: i32, %arg2: i32) -> (i32, i32) {
    %c0_i32 = arith.constant 0 : i32
    return %arg1, %arg2 : i32, i32
  }
  func.func @transform_2(%arg0: i32, %arg1: i32, %arg2: i32) -> (i32, i32) {
    %c0_i32 = arith.constant 0 : i32
    return %arg1, %arg2 : i32, i32
  }
  func.func @transform_3(%arg0: i32, %arg1: i32, %arg2: i32) -> (i32, i32) {
    %c0_i32 = arith.constant 0 : i32
    %c0_i32_0 = arith.constant 0 : i32
    return %c0_i32, %arg1 : i32, i32
  }
  func.func @transform_4(%arg0: i32, %arg1: i32, %arg2: i32) -> (i32, i32) {
    %c0_i32 = arith.constant 0 : i32
    return %arg0, %arg1 : i32, i32
  }
}

</mosaic_0001>

<bundles_post_ra>
// kernel: tpu_custom_call.1
= control target key start
LH: loop header
LB: loop body
LE: loop exit
PB: predicated region body
PF: predicated region fallthrough
CT: control target
= control target key end

     0   :  { %9 = vsyncpa [#allocation3], 0  ;;  %s439_s0 = inlined_call_operand.hbm [shape: f32[8,128], index: 0, kind: input, shape index: {}]   ;;  %s440_s1 = inlined_call_operand.hbm [shape: f32[128,128], index: 1, kind: input, shape index: {}]   ;;  %s441_s2 = inlined_call_operand.hbm [shape: s8[128,128], index: 2, kind: input, shape index: {}]   ;;  %s442_s3 = inlined_call_operand.vmem [shape: f32[1,128], index: 3, kind: input, shape index: {}]   ;;  %s443_s4 = inlined_call_operand.hbm [shape: f32[8,128], index: 4, kind: output, shape index: {}]  }
   0x1   :  { %10 = vsyncpa [#allocation6], 0 }
   0x2   :  { %11 = vsyncpa [#allocation4], 0  ;;  %s374_s15 = smov [#allocation5]  }
   0x3   :  { %s27_s16 = sshll.u32 %s374_s15, 4  ;;  %s28_s16 = int_to_ptr.vmem [resolvable:$true] %s27_s16 }
   0x4   :  { %s296_s17 = scalar_lea.vmem %s28_s16, 2048  ;;  %p301_p1 = scmp.lt.s32.totalorder %s28_s16, %s28_s16 }
   0x5   :  { %p297_p0 = scmp.ne.s32.totalorder %s28_s16, %s296_s17  ;;  %p302_p2 = scmp.lt.s32.totalorder %s296_s17, %s296_s17 }
   0x7   :  { %p303_p3 = por %p302_p2, %p301_p1 }
   0x9   :  { %p304_p4 = pnand %p303_p3, %p297_p0 }
   0xb   :  { %307 = shalt.err (!%p304_p4)
}
   0xc   :  { %s375_s18 = smov 128   ;;  %s376_s19 = smov 8  }
   0xd   :  { %33 = dma.hbm_to_vmem [thread:$0]  %s440_s1, 2048, %s28_s16, [#allocation6], %s375_s18, %s375_s18, %s376_s19  }
   0xe   :  { %s377_s22 = smov [#allocation2]   ;;  %s378_s24 = smov [#allocation7]  }
   0xf   :  { %s18_s23 = sshll.u32 %s377_s22, 4  ;;  %s39_s25 = sshll.u32 %s378_s24, 4  ;;  %s19_s23 = int_to_ptr.vmem [resolvable:$true] %s18_s23  ;;  %s40_s25 = int_to_ptr.vmem [resolvable:$true] %s39_s25 }
  0x10   :  { %s316_s26 = scalar_lea.vmem %s19_s23, 128  ;;  %p321_p6 = scmp.lt.s32.totalorder %s19_s23, %s19_s23 }
  0x11   :  { %p317_p5 = scmp.ne.s32.totalorder %s19_s23, %s316_s26  ;;  %p322_p7 = scmp.lt.s32.totalorder %s316_s26, %s316_s26 }
  0x13   :  { %p323_p8 = por %p322_p7, %p321_p6 }
  0x15   :  { %p324_p9 = pnand %p323_p8, %p317_p5 }
  0x17   :  { %327 = shalt.err (!%p324_p9)
}
  0x18   :  { %21 = dma.hbm_to_vmem [thread:$0]  %s439_s0, 128, %s19_s23, [#allocation3]  }
  0x19   :  { %s336_s29 = scalar_lea.vmem %s40_s25, 512  ;;  %p341_p11 = scmp.lt.s32.totalorder %s40_s25, %s40_s25 }
  0x1a   :  { %p337_p10 = scmp.ne.s32.totalorder %s40_s25, %s336_s29  ;;  %p342_p12 = scmp.lt.s32.totalorder %s336_s29, %s336_s29 }
  0x1c   :  { %p343_p13 = por %p342_p12, %p341_p11 }
  0x1e   :  { %p344_p0 = pnand %p343_p13, %p337_p10 }
  0x20   :  { %347 = shalt.err (!%p344_p0)
}
  0x21   :  { %45 = dma.hbm_to_vmem [thread:$0]  %s441_s2, 512, %s40_s25, [#allocation6], %s375_s18, %s375_s18, %s376_s19  }
  0x22   :  { %368 = dma.done.wait [#allocation3], 128  }
  0x23   :  { %369 = vsyncadd [#allocation3], 4294967168 }
  0x24   :  { %370 = dma.done.wait [#allocation6], 2560  }
  0x25   :  { %371 = vsyncadd [#allocation6], 4294964736  ;;  %v379_v0 = vmov 0.0   ;;  %vm380_vm0 = vmmov 0   ;;  %v88_v1 = vld [vmem:[#allocation7 + $0x18] sm:$0xff]  ;;  %v83_v8 = vld [vmem:[#allocation5 + $0x70] sm:$0xff] }
  0x26   :  { %245 = vmatprep.subr.mxu0 %v379_v0  ;;  %277 = vmatprep.mubr.msk.f32.mxu0 %vm380_vm0, %v379_v0  ;;  %v104_v2 = vunpack.c.3.s8 %v88_v1  ;;  %v103_v3 = vunpack.c.2.s8 %v88_v1  ;;  %v84_v4 = vld [vmem:[#allocation5 + $0x78] sm:$0xff]  ;;  %v102_v7 = vunpack.c.1.s8 %v88_v1  ;;  %v101_v12 = vunpack.c.0.s8 %v88_v1  ;;  %v82_v13 = vld [vmem:[#allocation5 + $0x68] sm:$0xff]  ;;  %v87_v14 = vld [vmem:[#allocation7 + $0x10] sm:$0xff]  ;;  %s381_s5 = smov [#allocation8]  }
  0x27   :  { %v100_v17 = vunpack.c.3.s8 %v87_v14  ;;  %v81_v18 = vld [vmem:[#allocation5 + $0x60] sm:$0xff]  ;;  %v99_v21 = vunpack.c.2.s8 %v87_v14  ;;  %v80_v22 = vld [vmem:[#allocation5 + $0x58] sm:$0xff]  ;;  %v98_v25 = vunpack.c.1.s8 %v87_v14  ;;  %v79_v26 = vld [vmem:[#allocation5 + $0x50] sm:$0xff]  ;;  %v97_v29 = vunpack.c.0.s8 %v87_v14  ;;  %s217_s6 = sshll.u32 %s381_s5, 4  ;;  %s218_s6 = int_to_ptr.vmem [resolvable:$true] %s217_s6 }
  0x28   :  { %v120_v5 = vcvt.s32.f32 %v104_v2  ;;  %v119_v6 = vcvt.s32.f32 %v103_v3  ;;  %v118_v11 = vcvt.s32.f32 %v102_v7  ;;  %v117_v16 = vcvt.s32.f32 %v101_v12  ;;  %v78_v30 = vld [vmem:[#allocation5 + $0x48] sm:$0xff]  ;;  %v77_v35 = vld [vmem:[#allocation5 + $0x40] sm:$0xff]  ;;  %v76_v39 = vld [vmem:[#allocation5 + $0x38] sm:$0xff]  ;;  %s348_s7 = scalar_lea.vmem %s218_s6, 128  ;;  %p353_p2 = scmp.lt.s32.totalorder %s218_s6, %s218_s6 }
  0x29   :  { %v116_v20 = vcvt.s32.f32 %v100_v17  ;;  %v115_v24 = vcvt.s32.f32 %v99_v21  ;;  %v114_v28 = vcvt.s32.f32 %v98_v25  ;;  %v86_v31 = vld [vmem:[#allocation7 + $0x8] sm:$0xff]  ;;  %v113_v33 = vcvt.s32.f32 %v97_v29  ;;  %v75_v43 = vld [vmem:[#allocation5 + $0x30] sm:$0xff]  ;;  %v85_v48 = vld [vmem:[#allocation7] sm:$0xff]  ;;  %p349_p1 = scmp.ne.s32.totalorder %s218_s6, %s348_s7  ;;  %p354_p3 = scmp.lt.s32.totalorder %s348_s7, %s348_s7 }
  0x2a   :  { %v136_v9 = vmul.f32 %v120_v5, %v84_v4  ;;  %v135_v10 = vmul.f32 %v119_v6, %v83_v8  ;;  %v134_v15 = vmul.f32 %v118_v11, %v82_v13  ;;  %v133_v19 = vmul.f32 %v117_v16, %v81_v18  ;;  %v74_v47 = vld [vmem:[#allocation5 + $0x28] sm:$0xff]  ;;  %v73_v52 = vld [vmem:[#allocation5 + $0x20] sm:$0xff]  ;;  %v72_v56 = vld [vmem:[#allocation5 + $0x18] sm:$0xff] }
  0x2b   :  { %v132_v23 = vmul.f32 %v116_v20, %v80_v22  ;;  %v131_v27 = vmul.f32 %v115_v24, %v79_v26  ;;  %v130_v32 = vmul.f32 %v114_v28, %v78_v30  ;;  %v96_v34 = vunpack.c.3.s8 %v86_v31  ;;  %v71_v60 = vld [vmem:[#allocation5 + $0x10] sm:$0xff]  ;;  %v70_v1 = vld [vmem:[#allocation5 + $0x8] sm:$0xff]  ;;  %v69_v4 = vld [vmem:[#allocation5] sm:$0xff]  ;;  %p355_p4 = por %p354_p3, %p353_p2 }
  0x2c   :  { %246 = vmatpush3.xpose.msra.mxu0 %v136_v9  ;;  %v129_v36 = vmul.f32 %v113_v33, %v77_v35  ;;  %v95_v38 = vunpack.c.2.s8 %v86_v31  ;;  %v94_v42 = vunpack.c.1.s8 %v86_v31  ;;  %v93_v46 = vunpack.c.0.s8 %v86_v31  ;;  %v138_v6 = vld [vmem:[#allocation2] sm:$0xff] }
  0x2d   :  { %247 = vmatprep.subr.mxu0 %v379_v0  ;;  %v112_v37 = vcvt.s32.f32 %v96_v34  ;;  %v92_v51 = vunpack.c.3.s8 %v85_v48  ;;  %v91_v55 = vunpack.c.2.s8 %v85_v48  ;;  %v90_v59 = vunpack.c.1.s8 %v85_v48  ;;  %v227_v7 = vld [vmem:[%s442_s3] ss:$0 sm:$0xff]  ;;  %p356_p5 = pnand %p355_p4, %p349_p1 }
  0x2e   :  { %v111_v41 = vcvt.s32.f32 %v95_v38  ;;  %v110_v45 = vcvt.s32.f32 %v94_v42  ;;  %v109_v50 = vcvt.s32.f32 %v93_v46  ;;  %v89_v63 = vunpack.c.0.s8 %v85_v48 }
  0x2f   :  { %v128_v40 = vmul.f32 %v112_v37, %v76_v39  ;;  %v108_v54 = vcvt.s32.f32 %v92_v51  ;;  %v107_v58 = vcvt.s32.f32 %v91_v55  ;;  %v106_v62 = vcvt.s32.f32 %v90_v59 }
  0x30   :  { %248 = vmatpush3.xpose.msra.mxu0 %v135_v10  ;;  %v127_v44 = vmul.f32 %v111_v41, %v75_v43  ;;  %v126_v49 = vmul.f32 %v110_v45, %v74_v47  ;;  %v125_v53 = vmul.f32 %v109_v50, %v73_v52  ;;  %v105_v3 = vcvt.s32.f32 %v89_v63 }
  0x31   :  { %249 = vmatprep.subr.mxu0 %v379_v0  ;;  %v124_v57 = vmul.f32 %v108_v54, %v72_v56  ;;  %v123_v61 = vmul.f32 %v107_v58, %v71_v60  ;;  %v122_v2 = vmul.f32 %v106_v62, %v70_v1 }
  0x32   :  { %v121_v5 = vmul.f32 %v105_v3, %v69_v4 }
  0x34   :  { %250 = vmatpush3.xpose.msra.mxu0 %v134_v15 }
  0x35   :  { %251 = vmatprep.subr.mxu0 %v379_v0 }
  0x38   :  { %252 = vmatpush3.xpose.msra.mxu0 %v133_v19 }
  0x39   :  { %253 = vmatprep.subr.mxu0 %v379_v0 }
  0x3c   :  { %254 = vmatpush3.xpose.msra.mxu0 %v132_v23 }
  0x3d   :  { %255 = vmatprep.subr.mxu0 %v379_v0 }
  0x40   :  { %256 = vmatpush3.xpose.msra.mxu0 %v131_v27 }
  0x41   :  { %257 = vmatprep.subr.mxu0 %v379_v0 }
  0x44   :  { %258 = vmatpush3.xpose.msra.mxu0 %v130_v32 }
  0x45   :  { %259 = vmatprep.subr.mxu0 %v379_v0 }
  0x48   :  { %260 = vmatpush3.xpose.msra.mxu0 %v129_v36 }
  0x49   :  { %261 = vmatprep.subr.mxu0 %v379_v0 }
  0x4c   :  { %262 = vmatpush3.xpose.msra.mxu0 %v128_v40 }
  0x4d   :  { %263 = vmatprep.subr.mxu0 %v379_v0 }
  0x50   :  { %264 = vmatpush3.xpose.msra.mxu0 %v127_v44 }
  0x51   :  { %265 = vmatprep.subr.mxu0 %v379_v0 }
  0x54   :  { %266 = vmatpush3.xpose.msra.mxu0 %v126_v49 }
  0x55   :  { %267 = vmatprep.subr.mxu0 %v379_v0 }
  0x58   :  { %268 = vmatpush3.xpose.msra.mxu0 %v125_v53 }
  0x59   :  { %269 = vmatprep.subr.mxu0 %v379_v0 }
  0x5c   :  { %270 = vmatpush3.xpose.msra.mxu0 %v124_v57 }
  0x5d   :  { %271 = vmatprep.subr.mxu0 %v379_v0 }
  0x60   :  { %272 = vmatpush3.xpose.msra.mxu0 %v123_v61 }
  0x61   :  { %273 = vmatprep.subr.mxu0 %v379_v0 }
  0x64   :  { %274 = vmatpush3.xpose.msra.mxu0 %v122_v2 }
  0x65   :  { %275 = vmatprep.subr.mxu0 %v379_v0 }
  0x68   :  { %276 = vmatpush3.xpose.msra.mxu0 %v121_v5 }
  0x6b   :  { %278 = vmatmul.mubr.f32.vlgmr.msra.gmra.mxu0 %v138_v6 }
 0x12b   :  { %v205_v8 = vpop.f32.mrf.mxu0 }
 0x12c   :  { %v209_v9 = vadd.f32 %v227_v7, %v205_v8 }
 0x12d   :  { %v279_v10 = vpop.f32.mrf.mxu0 }
 0x12e   :  { %210 = vst [vmem:[#allocation8] sm:$0xff] %v209_v9 }
 0x12f   :  { %359 = shalt.err (!%p356_p5)
}
 0x130   :  { %220 = dma.vmem_to_hbm [thread:$0]  %s218_s6, 128, %s443_s4, [#allocation4]  }
 0x131   :  { %372 = dma.done.wait [#allocation4], 128  }
 0x132   :  { %373 = vsyncadd [#allocation4], 4294967168 }
 0x133   :  { %224 = vsyncpa [#allocation3], 1 }
 0x134   :  { %225 = vsyncpa [#allocation6], 1 }
 0x135   :  { %226 = vsyncpa [#allocation4], 1 }

</bundles_post_ra>
